<compile_context>
chip_gen: v7x
topology: tpu7x:2x2x1
jax: 0.10.0
libtpu: 0.0.40
codegen_flags: <defaults>
</compile_context>

<pallas_src>
from collections import OrderedDict
from functools import partial

import jax
import jax.numpy as jnp
from jax.experimental import pallas as pl
from jax.experimental.pallas import tpu as pltpu


def _round_up(x, m):
    return ((x + m - 1) // m) * m


# ---------------------------------------------------------------------------
# Pallas kernel: im2col conv as one MXU matmul per tile (bias folded in)
# ---------------------------------------------------------------------------
def _conv_mm_kernel(p_ref, w_ref, o_ref):
    # p_ref: (TM, Kp) bf16 im2col patches (last column = 1.0 for bias)
    # w_ref: (Kp, TN) bf16 weights (bias row included)
    # o_ref: (TM, TN) bf16 output tile (lane-dense)
    acc = jnp.dot(p_ref[...], w_ref[...], preferred_element_type=jnp.float32)
    o_ref[...] = acc.astype(o_ref.dtype)


def conv3x3_same(x, w, b):
    """3x3 conv, stride 1, padding 1 (PyTorch Conv2d(Cin, Cout, 3, 1, 1)).

    x: (N, H, W, Cin) NHWC (any float dtype).
    w: (Cout, Cin, 3, 3) PyTorch layout.  b: (Cout,).
    Returns (N, H, W, Cout) in bf16.
    """
    N, H, W, Cin = x.shape
    Cout = w.shape[0]
    M = H * W
    K = 9 * Cin

    TM = 128
    Kp = _round_up(K + 1, 128)                 # +1 = folded-bias ones column
    Cp = _round_up(Cout, 128)
    TN = 256 if Cp % 256 == 0 else 128         # fill 256-wide MXU on v6e/v7x
    R = N * M
    Rp = _round_up(R, TM)

    # --- wrapper-side im2col: (R, K) bf16 patches (fuses under jit) ---
    # TODO(synk): move the 1-pixel halo into the kernel at large resolutions.
    xp = jnp.pad(x, ((0, 0), (1, 1), (1, 1), (0, 0)))
    cols = [xp[:, dy:dy + H, dx:dx + W, :] for dy in range(3) for dx in range(3)]
    patches = jnp.concatenate(cols, axis=-1).reshape(R, K).astype(jnp.bfloat16)
    ones_col = jnp.ones((R, 1), jnp.bfloat16)                    # bias column
    patches = jnp.concatenate([patches, ones_col], axis=-1)
    patches = jnp.pad(patches, ((0, Rp - R), (0, Kp - (K + 1))))  # row/K pad

    # --- weights: (Cout, Cin, 3, 3) -> (K, Cout), bias row, pad to (Kp, Cp) ---
    w2 = jnp.transpose(w, (2, 3, 1, 0)).reshape(K, Cout)  # tap order == cols
    w2 = jnp.concatenate([w2, b.reshape(1, Cout)], axis=0)
    w2 = jnp.pad(w2, ((0, Kp - (K + 1)), (0, Cp - Cout))).astype(jnp.bfloat16)

    cost = pl.CostEstimate(
        flops=2 * Rp * Kp * Cp,
        transcendentals=0,
        bytes_accessed=2 * (Rp * Kp + Kp * Cp + Rp * Cp),
    )

    out = pl.pallas_call(
        _conv_mm_kernel,
        out_shape=jax.ShapeDtypeStruct((Rp, Cp), jnp.bfloat16),
        grid_spec=pltpu.PrefetchScalarGridSpec(
            num_scalar_prefetch=0,
            grid=(Rp // TM, Cp // TN),
            in_specs=[
                pl.BlockSpec((TM, Kp), lambda r, c: (r, 0)),
                pl.BlockSpec((Kp, TN), lambda r, c: (0, c)),
            ],
            out_specs=pl.BlockSpec((TM, TN), lambda r, c: (r, c)),
        ),
        compiler_params=pltpu.CompilerParams(
            dimension_semantics=("parallel", "parallel"),
            vmem_limit_bytes=32 * 1024 * 1024),
        cost_estimate=cost,
    )(patches, w2)

    # un-pad rows/channels and restore NHWC (layout plumbing, fuses under jit)
    return out[:R, :Cout].reshape(N, H, W, Cout)


# ---------------------------------------------------------------------------
# nn.MaxPool2d(kernel_size=1, stride=2, padding=0): a 1x1 window has nothing
# to max over -> pure stride-2 subsampling (strided slice, no kernel needed).
# ---------------------------------------------------------------------------
def subsample2(x):
    """x: (N, H, W, C) -> (N, ceil(H/2), ceil(W/2), C).  == MaxPool2d(1,2,0)."""
    return x[:, ::2, ::2, :]


# ---------------------------------------------------------------------------
# Parameter construction (deterministic, in-script)
# ---------------------------------------------------------------------------
def init_params(key, input_channels, num_filters, num_levels, out_channels_backbone):
    def conv_init(k, cout, cin):
        kw, kb = jax.random.split(k)
        w = jax.random.normal(kw, (cout, cin, 3, 3), jnp.float32) * 0.05
        b = jax.random.normal(kb, (cout,), jnp.float32) * 0.05
        return w, b

    keys = jax.random.split(key, 2 * num_levels)
    params = {"body": [], "rz": []}
    # body conv pyramid: level ii has num_filters * 2**ii output channels
    cin = input_channels
    for ii in range(num_levels):
        cout = num_filters * (2 ** ii)
        params["body"].append(conv_init(keys[ii], cout, cin))
        cin = cout
    # rz_ch_list: Conv2d(num_filters * 2**ii, out_channels_backbone, 3, 1, 1)
    for ii in range(num_levels):
        cin_ii = num_filters * (2 ** ii)
        params["rz"].append(conv_init(keys[num_levels + ii],
                                      out_channels_backbone, cin_ii))
    return params


# ---------------------------------------------------------------------------
# Forward pass (mirrors RecResNetbackbone.forward; FasterRCNN heads -> TODO)
# ---------------------------------------------------------------------------
def network_segmentation_forward(params, x_nchw, target=None):
    del target  # TODO(synk): detection losses / RoI heads not reproducible here
    x = jnp.transpose(x_nchw, (0, 2, 3, 1))          # NCHW -> NHWC

    # --- body (approximated RecResNet): conv pyramid, bf16 activations ---
    h = []
    feat = x
    for ii, (w, b) in enumerate(params["body"]):
        if ii > 0:
            feat = subsample2(feat)                  # downsample between levels
        feat = conv3x3_same(feat, w, b)              # bf16 out, re-used as-is
        h.append(feat)

    # --- RecResNetbackbone head ---
    extra_features = 5 - len(h)
    output = []
    tensor = None
    for ii, value in enumerate(h):
        w, b = params["rz"][ii]
        tensor = conv3x3_same(value, w, b)
        output.append((str(ii), tensor))
    tensor = subsample2(tensor)
    for jj in range(extra_features):
        output.append((str(len(h) + jj), tensor))
        if jj < extra_features - 1:                  # final pool result unused
            tensor = subsample2(tensor)

    # back to NCHW, f32 at the FPN interface to match the PyTorch convention
    return OrderedDict(
        (k, jnp.transpose(v, (0, 3, 1, 2)).astype(jnp.float32))
        for k, v in output)


network_segmentation_forward_jit = jax.jit(network_segmentation_forward)


# ---------------------------------------------------------------------------
if __name__ == "__main__":
    # small shapes consistent with the module
    N, C_IN, H, W = 2, 4, 16, 16
    NUM_FILTERS = 8
    BLOCKS_PER_LAYER = [1, 1]          # -> 2 pyramid levels
    OUT_CHANNELS_BACKBONE = 256        # fixed inside NETWORK_SEGMENTATION.__init__

    key = jax.random.PRNGKey(0)
    kx, kp = jax.random.split(key)
    x = jax.random.normal(kx, (N, C_IN, H, W), jnp.float32)

    params = init_params(kp, C_IN, NUM_FILTERS, len(BLOCKS_PER_LAYER),
                         OUT_CHANNELS_BACKBONE)

    # --- correctness check of the conv kernel vs XLA f32 conv (bf16 tol) ---
    w0, b0 = params["body"][0]
    x_nhwc = jnp.transpose(x, (0, 2, 3, 1))
    y_pallas = conv3x3_same(x_nhwc, w0, b0).astype(jnp.float32)
    y_ref = jax.lax.conv_general_dilated(
        x_nhwc, jnp.transpose(w0, (2, 3, 1, 0)), (1, 1), "SAME",
        dimension_numbers=("NHWC", "HWIO", "NHWC")) + b0
    err = float(jnp.max(jnp.abs(y_pallas - y_ref)))
    assert err < 0.1, f"conv mismatch, max abs err {err}"

    # --- full forward (jit: fuses im2col plumbing between pallas_calls) ---
    feats = network_segmentation_forward_jit(params, x)
    for v in feats.values():
        jax.block_until_ready(v)

    # sanity: FPN keys "0".."4", 256 channels, halving spatial dims
    expected = {
        "0": (N, 256, 16, 16),
        "1": (N, 256, 8, 8),
        "2": (N, 256, 4, 4),
        "3": (N, 256, 2, 2),
        "4": (N, 256, 1, 1),
    }
    assert list(feats.keys()) == list(expected.keys())
    for k, shp in expected.items():
        assert feats[k].shape == shp, (k, feats[k].shape, shp)

    print("KERNEL_OK")
</pallas_src>

<mosaic_0001>
module attributes {stable_mosaic.version = 11 : i64} {
  func.func @_conv_mm_kernel(%arg0: i32, %arg1: i32, %arg2: memref<128x128xbf16, #tpu.memory_space<vmem>>, %arg3: memref<128x128xbf16, #tpu.memory_space<vmem>>, %arg4: memref<128x128xbf16, #tpu.memory_space<vmem>>) attributes {dimension_semantics = [#tpu.dimension_semantics<parallel>, #tpu.dimension_semantics<parallel>], iteration_bounds = array<i64: 4, 1>, scalar_prefetch = 0 : i64, scratch_operands = 0 : i64, tpu.core_type = #tpu.core_type<tc>, window_params = [{transform_indices = @transform_0, window_bounds = array<i64: 128, 128>}, {transform_indices = @transform_1, window_bounds = array<i64: 128, 128>}, {transform_indices = @transform_2, window_bounds = array<i64: 128, 128>}]} {
    %c0 = arith.constant 0 : index
    %c0_0 = arith.constant 0 : index
    %0 = vector.load %arg2[%c0, %c0_0] : memref<128x128xbf16, #tpu.memory_space<vmem>>, vector<128x128xbf16>
    %c0_1 = arith.constant 0 : index
    %c0_2 = arith.constant 0 : index
    %1 = vector.load %arg3[%c0_1, %c0_2] : memref<128x128xbf16, #tpu.memory_space<vmem>>, vector<128x128xbf16>
    %cst = arith.constant dense<0.000000e+00> : vector<128x128xf32>
    %2 = tpu.matmul %0, %1, %cst {dimension_numbers = #tpu.dot_dimension_numbers<[1], [0], [0], [1], [0, 0, 1, 1], [], []>} : vector<128x128xbf16>, vector<128x128xbf16>, vector<128x128xf32> -> vector<128x128xf32>
    %3 = arith.truncf %2 : vector<128x128xf32> to vector<128x128xbf16>
    %c0_3 = arith.constant 0 : index
    %c0_4 = arith.constant 0 : index
    %4 = vector.load %arg4[%c0_3, %c0_4] : memref<128x128xbf16, #tpu.memory_space<vmem>>, vector<128x128xbf16>
    tpu.vector_store %arg4[%c0_3, %c0_4], %3 {strides = array<i32>} : memref<128x128xbf16, #tpu.memory_space<vmem>>, vector<128x128xbf16>,
    return
  }
  func.func @transform_0(%arg0: i32, %arg1: i32) -> (i32, i32) {
    %c0_i32 = arith.constant 0 : i32
    %c0_i32_0 = arith.constant 0 : i32
    return %arg0, %c0_i32 : i32, i32
  }
  func.func @transform_1(%arg0: i32, %arg1: i32) -> (i32, i32) {
    %c0_i32 = arith.constant 0 : i32
    %c0_i32_0 = arith.constant 0 : i32
    return %c0_i32, %arg1 : i32, i32
  }
  func.func @transform_2(%arg0: i32, %arg1: i32) -> (i32, i32) {
    %c0_i32 = arith.constant 0 : i32
    return %arg0, %arg1 : i32, i32
  }
}

</mosaic_0001>

<bundles_post_ra>
// kernel: tpu_custom_call.1
= control target key start
LH: loop header
LB: loop body
LE: loop exit
PB: predicated region body
PF: predicated region fallthrough
CT: control target
= control target key end

     0   :  { %7 = vsyncpa [#allocation3], 0  ;;  %s1292_s0 = inlined_call_operand.hbm [shape: bf16[512,128], index: 0, kind: input, shape index: {}]   ;;  %s1293_s1 = inlined_call_operand.hbm [shape: bf16[128,128], index: 1, kind: input, shape index: {}]   ;;  %s1294_s2 = inlined_call_operand.hbm [shape: bf16[512,128], index: 2, kind: output, shape index: {}]  }
   0x1   :  { %9 = vsyncpa [#allocation3 + $0x1], 0 }
   0x2   :  { %10 = vsyncpa [#allocation6], 0 }
   0x3   :  { %11 = vsyncpa [#allocation4], 0 }
   0x4   :  { %13 = vsyncpa [#allocation4 + $0x1], 0  ;;  %s1055_s9 = smov 0   ;;  %s1057_s10 = smov 0  }
   0x5   :  { %s1059_s11 = smov 0   ;;  %s1061_s12 = smov 0  }
   0x6   :  { %s1063_s13 = smov 0   ;;  %s1065_s14 = smov 0  }
   0x7 LB: > { %s616_s15 = sadd.s32 4294967295, %s1031_s14   ;;  %s617_s16 = sadd.s32 4294967294, %s1031_s14   ;;  %s1031_s14 = sphi %s1065_s14, %s19_s14   ;;  %s1027_s13 = sphi %s1063_s13, %s1317_s13   ;;  %s1023_s12 = sphi %s1061_s12, %s1316_s12   ;;  %s1019_s11 = sphi %s1059_s11, %s1315_s11   ;;  %s1015_s10 = sphi %s1057_s10, %s1314_s10   ;;  %s1011_s9 = sphi %s1055_s9, %s1313_s9  }
   0x8   : > { %p51_p0 = scmp.ne.s32.totalorder %s1015_s10, %s1011_s9  ;;  %p1089_p1 = scmp.eq.s32.totalorder %s616_s15, 0 }
   0x9   : > { %p1093_p2 = scmp.eq.s32.totalorder %s616_s15, 3  ;;  %p109_p3 = scmp.eq.s32.totalorder %s617_s16, 3 }
   0xa   : > { %s1299_s17 = scalar_select %p1089_p1, 1, 0 }
   0xb   : > { %s1300_s18 = scalar_select %p1093_p2, 1, 0 }
   0xc   : > { %p1099_p4 = por %p1089_p1, %p51_p0  ;;  %p618_p5 = scmp.ge.s32.totalorder %s1031_s14, 1 }
   0xd   : > { %p1104_p6 = por %p109_p3, %p51_p0  ;;  %p116_p7 = scmp.lt.s32.totalorder %s1031_s14, 5 }
   0xe   : > { %s1301_s19 = scalar_select %p1099_p4, 1, 0 }
   0xf   : > { %s1302_s20 = scalar_select %p1104_p6, 1, 0 }
  0x10   : > { %p1109_p8 = pnand %p618_p5, %p116_p7  ;;  %s1033_s22 = smov [#allocation5]  }
  0x11   : > { %s130_s23 = sshll.u32 %s1033_s22, 4  ;;  %s31_s25 = sadd.s32 1, %s1027_s13  ;;  %s131_s23 = int_to_ptr.vmem [resolvable:$true] %s130_s23 }
  0x12   : > { %s1303_s21 = scalar_select %p1109_p8, 1, 0 }
  0x13   : > { %p802_p9 = pneg %p1109_p8  ;;  %s887_s28 = scalar_lea.hbm %s1293_s1, 1024 }
  0x14   : > { %p888_p11 = scmp.ne.s32.totalorder %s1293_s1, %s887_s28  ;;  %p894_p3 = scmp.lt.u32.totalorder %s887_s28, %s1293_s1 }
  0x15   : > { %p1117_p10 = pnand %p802_p9, %p1089_p1 }
  0x17   : > { %p889_p12 = pneg %p1117_p10 }
  0x19   : > { %p890_p13 = pnand %p889_p12, %p888_p11 }
  0x1b   : > { %p891_p0 = pneg %p890_p13 }
  0x1d   : > { %p896_p5 = pnand %p894_p3, %p891_p0 }
  0x1f   : > { %899 = shalt.err (!%p896_p5)
}
  0x20   : > { %s900_s5 = scalar_lea.vmem %s131_s23, 1024  ;;  %p908_p1 = scmp.lt.s32.totalorder %s131_s23, %s131_s23 }
  0x21   : > { %p901_p7 = scmp.ne.s32.totalorder %s131_s23, %s900_s5  ;;  %p909_p4 = scmp.lt.s32.totalorder %s900_s5, %s900_s5 }
  0x23   : > { %p903_p9 = pnand %p901_p7, %p889_p12  ;;  %p910_p8 = por %p909_p4, %p908_p1 }
  0x25   : > { %p904_p6 = pneg %p903_p9 }
  0x27   : > { %p911_p2 = pnand %p910_p8, %p904_p6 }
  0x29   : > { %914 = shalt.err (!%p911_p2)
}
  0x2a   : > { %s1034_s6 = smov 64   ;;  %s1035_s7 = smov 4  }
  0x2b   : > { %805 = dma.hbm_to_vmem [thread:$0]  (!%p1117_p10), %s1293_s1, 1024, %s131_s23, [#allocation6], %s1034_s6, %s1034_s6, %s1035_s7  }
  0x2c   : > { %p33_p1 = scmp.ge.s32.totalorder %s31_s25, 4  ;;  %s38_s16 = sadd.s32 1, %s1019_s11 }
  0x2d   : > { %p45_p2 = scmp.ne.s32.totalorder %s1019_s11, %s1015_s10  ;;  %p46_p4 = scmp.eq.s32.totalorder %s1031_s14, 0 }
  0x2e   : > { %s1319_s25 = smov (%p33_p1, %s31_s25), 0  ;;  %p1306_p8 = scmp.ne.s32.totalorder %s1300_s18, 0 }
  0x2f   : > { %p1147_p6 = por %p46_p4, %p45_p2  ;;  %s35_s26 = ssub.s32 %s1027_s13, %s1319_s25 }
  0x30   : > { %p1153_p11 = por %p1306_p8, %p45_p2  ;;  %p815_p12 = scmp.lt.s32.totalorder %s1031_s14, 4 }
  0x31   : > { %p36_p10 = scmp.eq.s32.totalorder %s35_s26, 0  ;;  %s144_s23 = sand.u32 1, %s1019_s11  }
  0x32   : > { %s621_s27 = sshll.u32 %s144_s23, 6  ;;  %s665_s29 = sshll.u32 %s1027_s13, 10 }
  0x33   : > { %s1162_s28 = scalar_select %p36_p10, %s1019_s11, %s38_s16  }
  0x34   : > { %s1168_s4 = scalar_lea.hbm %s1292_s0, %s665_s29  ;;  %s148_s18 = scalar_lea.vmem [#allocation2], %s621_s27 }
  0x35   : > { %s155_s5 = sshll.u32 %s148_s18, 4  ;;  %p1174_p13 = pnand %p815_p12, %p1147_p6  ;;  %s1170_s5 = int_to_ptr.vmem [resolvable:$true] %s155_s5 }
  0x36   : > { %s1178_s15 = scalar_lea.sflag [#allocation3], %s144_s23  ;;  %s915_s16 = scalar_lea.hbm %s1168_s4, 1024 }
  0x37   : > { %p916_p0 = scmp.ne.s32.totalorder %s1168_s4, %s915_s16  ;;  %p917_p3 = pneg %p1174_p13 }
  0x38   : > { %s920_s22 = scalar_lea.hbm %s1292_s0, 4096  ;;  %p921_p9 = scmp.lt.u32.totalorder %s1168_s4, %s1292_s0 }
  0x39   : > { %p918_p5 = pnand %p917_p3, %p916_p0  ;;  %p922_p1 = scmp.lt.u32.totalorder %s920_s22, %s915_s16 }
  0x3a   : > { %p924_p4 = scmp.lt.u32.totalorder %s915_s16, %s1168_s4 }
  0x3b   : > { %p919_p7 = pneg %p918_p5  ;;  %p923_p2 = por %p922_p1, %p921_p9 }
  0x3d   : > { %p925_p6 = por %p924_p4, %p923_p2 }
  0x3f   : > { %p926_p8 = pnand %p925_p6, %p919_p7 }
  0x41   : > { %929 = shalt.err (!%p926_p8)
}
  0x42   : > { %s930_s23 = scalar_lea.vmem %s1170_s5, 1024  ;;  %s1036_s3 = smov [#allocation2]  }
  0x43   : > { %p931_p12 = scmp.ne.s32.totalorder %s1170_s5, %s930_s23  ;;  %s935_s18 = sshll.u32 %s1036_s3, 4  ;;  %s936_s18 = int_to_ptr.vmem [resolvable:$false] %s935_s18 }
  0x44   : > { %s937_s26 = scalar_lea.vmem %s936_s18, 2048  ;;  %p938_p5 = scmp.lt.s32.totalorder %s1170_s5, %s936_s18 }
  0x45   : > { %p933_p10 = pnand %p931_p12, %p917_p3  ;;  %p939_p9 = scmp.lt.s32.totalorder %s937_s26, %s930_s23 }
  0x47   : > { %p934_p0 = pneg %p933_p10  ;;  %p940_p1 = por %p939_p9, %p938_p5 }
  0x49   : > { %p941_p2 = pnand %p940_p1, %p934_p0 }
  0x4b   : > { %944 = shalt.err (!%p941_p2)
}
  0x4c   : > { %809 = dma.hbm_to_vmem [thread:$0]  (!%p1174_p13), %s1168_s4, 1024, %s1170_s5, %s1178_s15, %s1034_s6, %s1034_s6, %s1035_s7  }
  0x4d   : > { %p1309_p3 = scmp.ne.s32.totalorder %s1303_s21, 0 }
  0x4e   : > { %s1212_s16 = sand.u32 (!%p1309_p3), 1, %s1015_s10   ;;  %p1310_p7 = scmp.ne.s32.totalorder (!%p1309_p3), %s1301_s19, 0 }
  0x4f   : > { %167 = sbr.rel (%p1309_p3) target bundleno = 363 (0x16b), region = 28  ;;  %s625_s27 = sshll.u32 (!%p1309_p3), %s1212_s16, 6 }
  0x50   : > { %s170_s22 = scalar_lea.sflag (!%p1309_p3), [#allocation3], %s1212_s16  ;;  %s1218_s8 = scalar_lea.vmem (!%p1309_p3), [#allocation2], %s625_s27 }
  0x56   : > { %998 = dma.done.wait (%p1310_p7), %s170_s22, 1024  }
  0x57   : > { %1000 = vsyncadd (%p1310_p7), %s170_s22, 4294966272  ;;  %p1311_p13 = scmp.ne.s32.totalorder %s1299_s17, 0 }
  0x59   : > { %1002 = dma.done.wait (%p1311_p13), [#allocation6], 1024  }
  0x5a   : > { %1004 = vsyncadd (%p1311_p13), [#allocation6], 4294966272  ;;  %v871_v0 = vld [vmem:[#allocation5] sm:$0xff]   ;;  %v872_v1 = vld [vmem:[#allocation5 + $0x8] sm:$0xff]   ;;  %s197_s17 = scalar_lea.vmem [#allocation7], %s625_s27  ;;  %s682_s21 = sshll.u32 %s1023_s12, 10 }
  0x5b   : > { %746 = vmatprep.subr.bf16.mxu0 %v871_v0  ;;  %778 = vmatprep.subr.bf16.mxu1 %v871_v0  ;;  %v873_v2 = vld [vmem:[#allocation5 + $0x10] sm:$0xff]   ;;  %v874_v3 = vld [vmem:[#allocation5 + $0x18] sm:$0xff]   ;;  %v879_v4 = vld [vmem:[%s1218_s8] sm:$0xff]   ;;  %s521_s19 = sshll.u32 %s197_s17, 4  ;;  %s1244_s4 = scalar_lea.hbm %s1294_s2, %s682_s21  ;;  %s1239_s19 = int_to_ptr.vmem [resolvable:$true] %s521_s19 }
  0x5c   : > { %747 = vmatpush3.bf16.msra.mxu0 %v871_v0  ;;  %786 = vmatpush3.bf16.msra.mxu1 %v871_v0  ;;  %v880_v5 = vld [vmem:[%s1218_s8 + $0x20] sm:$0xff]   ;;  %v876_v7 = vld [vmem:[#allocation5 + $0x28] sm:$0xff]   ;;  %v877_v8 = vld [vmem:[#allocation5 + $0x30] sm:$0xff]   ;;  %s507_s12 = scalar_lea.sflag [#allocation4], %s1212_s16  ;;  %s945_s5 = scalar_lea.vmem %s1239_s19, 1024 }
  0x5d   : > { %748 = vmatprep.subr.bf16.mxu0 %v872_v1  ;;  %779 = vmatprep.subr.bf16.mxu1 %v872_v1  ;;  %v875_v6 = vld [vmem:[#allocation5 + $0x20] sm:$0xff]   ;;  %v878_v9 = vld [vmem:[#allocation5 + $0x38] sm:$0xff]   ;;  %v881_v10 = vld [vmem:[%s1218_s8 + $0x8] sm:$0xff]   ;;  %p946_p4 = scmp.ne.s32.totalorder %s1239_s19, %s945_s5  ;;  %s1037_s15 = smov [#allocation7]  }
  0x5e   : > { %762 = vmatprep.mubr.bf16.mxu0 %v879_v4  ;;  %770 = vmatprep.mubr.bf16.mxu1 %v880_v5  ;;  %v882_v11 = vld [vmem:[%s1218_s8 + $0x28] sm:$0xff]   ;;  %v883_v12 = vld [vmem:[%s1218_s8 + $0x10] sm:$0xff]   ;;  %v885_v14 = vld [vmem:[%s1218_s8 + $0x18] sm:$0xff]   ;;  %s949_s29 = sshll.u32 %s1037_s15, 4  ;;  %s950_s29 = int_to_ptr.vmem [resolvable:$false] %s949_s29 }
  0x5f   : > { %v884_v13 = vld [vmem:[%s1218_s8 + $0x30] sm:$0xff]   ;;  %v886_v15 = vld [vmem:[%s1218_s8 + $0x38] sm:$0xff]   ;;  %p947_p6 = pnand %p946_p4, %p1153_p11  ;;  %s951_s30 = scalar_lea.vmem %s950_s29, 2048 }
  0x60   : > { %749 = vmatpush3.bf16.msra.mxu0 %v872_v1  ;;  %787 = vmatpush3.bf16.msra.mxu1 %v872_v1  ;;  %p952_p12 = scmp.lt.s32.totalorder %s1239_s19, %s950_s29  ;;  %p953_p10 = scmp.lt.s32.totalorder %s951_s30, %s945_s5 }
  0x61   : > { %750 = vmatprep.subr.bf16.mxu0 %v873_v2  ;;  %780 = vmatprep.subr.bf16.mxu1 %v873_v2  ;;  %p948_p8 = pneg %p947_p6 }
  0x62   : > { %p954_p0 = por %p953_p10, %p952_p12 }
  0x64   : > { %751 = vmatpush3.bf16.msra.mxu0 %v873_v2  ;;  %788 = vmatpush3.bf16.msra.mxu1 %v873_v2  ;;  %p955_p5 = pnand %p954_p0, %p948_p8 }
  0x65   : > { %752 = vmatprep.subr.bf16.mxu0 %v874_v3  ;;  %781 = vmatprep.subr.bf16.mxu1 %v874_v3 }
  0x68   : > { %753 = vmatpush3.bf16.msra.mxu0 %v874_v3  ;;  %789 = vmatpush3.bf16.msra.mxu1 %v874_v3 }
  0x69   : > { %754 = vmatprep.subr.bf16.mxu0 %v875_v6  ;;  %782 = vmatprep.subr.bf16.mxu1 %v875_v6 }
  0x6c   : > { %755 = vmatpush3.bf16.msra.mxu0 %v875_v6  ;;  %790 = vmatpush3.bf16.msra.mxu1 %v875_v6 }
  0x6d   : > { %756 = vmatprep.subr.bf16.mxu0 %v876_v7  ;;  %783 = vmatprep.subr.bf16.mxu1 %v876_v7 }
  0x70   : > { %757 = vmatpush3.bf16.msra.mxu0 %v876_v7  ;;  %791 = vmatpush3.bf16.msra.mxu1 %v876_v7 }
  0x71   : > { %758 = vmatprep.subr.bf16.mxu0 %v877_v8  ;;  %784 = vmatprep.subr.bf16.mxu1 %v877_v8 }
  0x74   : > { %759 = vmatpush3.bf16.msra.mxu0 %v877_v8  ;;  %792 = vmatpush3.bf16.msra.mxu1 %v877_v8 }
  0x75   : > { %760 = vmatprep.subr.bf16.mxu0 %v878_v9  ;;  %785 = vmatprep.subr.bf16.mxu1 %v878_v9 }
  0x78   : > { %761 = vmatpush3.bf16.msra.mxu0 %v878_v9  ;;  %793 = vmatpush3.bf16.msra.mxu1 %v878_v9 }
  0x7b   : > { %763 = vmatmul.mubr.bf16.vlgmr.msra.gmra.mrb[0].mxu0 %v881_v10  ;;  %771 = vmatmul.mubr.bf16.vlgmr.msra.gmra.mrb[0].mxu1 %v882_v11 }
  0x7c   : > { %766 = vmatprep.mubr.bf16.mxu0 %v883_v12  ;;  %774 = vmatprep.mubr.bf16.mxu1 %v884_v13 }
  0x83   : > { %767 = vmatmul.mubr.bf16.gmra.mrb[4].mxu0 %v885_v14  ;;  %775 = vmatmul.mubr.bf16.gmra.mrb[4].mxu1 %v886_v15 }
 0x14e   : > { %v764_v16 = vpop.f32.mrb[0].mxu0  ;;  %v772_v17 = vpop.f32.mrb[0].mxu1 }
 0x14f   : > { %v363_v18 = vpop.f32.mrb[1].mxu0  ;;  %v395_v19 = vpop.f32.mrb[1].mxu1 }
 0x150   : > { %v765_v20 = vpop.f32.mrb[2].mxu0  ;;  %v773_v21 = vpop.f32.mrb[2].mxu1 }
 0x151   : > { %v691_v22 = vpack.c.bf16 %v765_v20, %v764_v16  ;;  %v711_v23 = vpack.c.bf16 %v773_v21, %v772_v17  ;;  %v366_v24 = vpop.f32.mrb[3].mxu0  ;;  %v398_v25 = vpop.f32.mrb[3].mxu1 }
 0x152   : > { %v686_v26 = vpack.c.bf16 %v366_v24, %v363_v18  ;;  %v706_v27 = vpack.c.bf16 %v398_v25, %v395_v19 }
 0x153   : > { %723 = vst [vmem:[%s197_s17 + $0x8] sm:$0xff] %v691_v22   ;;  %727 = vst [vmem:[%s197_s17 + $0x28] sm:$0xff] %v711_v23  }
 0x154   : > { %687 = vst [vmem:[%s197_s17] sm:$0xff] %v686_v26   ;;  %726 = vst [vmem:[%s197_s17 + $0x20] sm:$0xff] %v706_v27  }
 0x156   : > { %v768_v28 = vpop.f32.mrb[4].mxu0  ;;  %v776_v29 = vpop.f32.mrb[4].mxu1 }
 0x157   : > { %v379_v30 = vpop.f32.mrb[5].mxu0  ;;  %v411_v31 = vpop.f32.mrb[5].mxu1 }
 0x158   : > { %v769_v32 = vpop.f32.mrb[6].mxu0  ;;  %v777_v33 = vpop.f32.mrb[6].mxu1 }
 0x159   : > { %v701_v34 = vpack.c.bf16 %v769_v32, %v768_v28  ;;  %v721_v35 = vpack.c.bf16 %v777_v33, %v776_v29  ;;  %v382_v36 = vpop.f32.mrb[7].mxu0  ;;  %v414_v37 = vpop.f32.mrb[7].mxu1 }
 0x15a   : > { %v696_v38 = vpack.c.bf16 %v382_v36, %v379_v30  ;;  %v716_v39 = vpack.c.bf16 %v414_v37, %v411_v31 }
 0x15b   : > { %725 = vst [vmem:[%s197_s17 + $0x18] sm:$0xff] %v701_v34   ;;  %729 = vst [vmem:[%s197_s17 + $0x38] sm:$0xff] %v721_v35  }
 0x15c   : > { %724 = vst [vmem:[%s197_s17 + $0x10] sm:$0xff] %v696_v38   ;;  %728 = vst [vmem:[%s197_s17 + $0x30] sm:$0xff] %v716_v39  }
 0x15d   : > { %958 = shalt.err (!%p955_p5)
}
 0x15e   : > { %s959_s23 = scalar_lea.hbm %s1244_s4, 1024  ;;  %s963_s26 = scalar_lea.hbm %s1294_s2, 4096 }
 0x15f   : > { %p960_p9 = scmp.ne.s32.totalorder %s1244_s4, %s959_s23  ;;  %p964_p3 = scmp.lt.u32.totalorder %s1244_s4, %s1294_s2 }
 0x160   : > { %p965_p7 = scmp.lt.u32.totalorder %s963_s26, %s959_s23  ;;  %p967_p4 = scmp.lt.u32.totalorder %s959_s23, %s1244_s4 }
 0x161   : > { %p961_p1 = pnand %p960_p9, %p1153_p11 }
 0x162   : > { %p966_p13 = por %p965_p7, %p964_p3 }
 0x163   : > { %p962_p2 = pneg %p961_p1 }
 0x164   : > { %p968_p6 = por %p967_p4, %p966_p13 }
 0x166   : > { %p969_p8 = pnand %p968_p6, %p962_p2 }
 0x168   : > { %972 = shalt.err (!%p969_p8)
}
 0x169   : > { %s1038_s8 = smov 64   ;;  %s1039_s17 = smov 4  }
 0x16a   : > { %800 = dma.vmem_to_hbm [thread:$0]  (%p1153_p11), %s1239_s19, 1024, %s1244_s4, %s507_s12, %s1038_s8, %s1038_s8, %s1039_s17  }
 0x16b PF: > { %p817_p12 = scmp.ge.s32.totalorder %s1031_s14, 2  ;;  %s536_s21 = sand.u32 1, %s1011_s9  }
 0x16c   : > { %p1312_p10 = scmp.ne.s32.totalorder %s1302_s20, 0  ;;  %s537_s6 = scalar_lea.sflag [#allocation4], %s536_s21 }
 0x16e   : > { %p811_p0 = pnand %p817_p12, %p1312_p10 }
 0x170   : > { %1006 = dma.done.wait (!%p811_p0), %s537_s6, 1024  }
 0x171   : > { %1008 = vsyncadd (!%p811_p0), %s537_s6, 4294966272  ;;  %s19_s14 = sadd.s32 1, %s1031_s14   ;;  %s1313_s9 = smov %s1015_s10 }
 0x172   : > { %p16_p5 = scmp.ge.s32.totalorder %s19_s14, 6   ;;  %s1314_s10 = smov %s1019_s11 }
 0x173   : > { %s1315_s11 = smov %s1162_s28  ;;  %s1316_s12 = smov %s1027_s13 }
 0x174   : > { %s1317_s13 = smov %s1319_s25  ;;  %18 = sbr.rel (!%p16_p5) target bundleno = 7 (0x7), region = 78 }
 0x17b   :  { %542 = vsyncpa [#allocation3], 1 }
 0x17c   :  { %544 = vsyncpa [#allocation3 + $0x1], 1 }
 0x17d   :  { %545 = vsyncpa [#allocation6], 1 }
 0x17e   :  { %546 = vsyncpa [#allocation4], 1 }
 0x17f   :  { %548 = vsyncpa [#allocation4 + $0x1], 1 }

</bundles_post_ra>
